<compile_context>
chip_gen: v6e
topology: v6e:2x2x1
jax: 0.10.0
libtpu: 0.0.40
codegen_flags: <defaults>
</compile_context>

<pallas_src>
import functools

import jax
import jax.numpy as jnp
from jax.experimental import pallas as pl
from jax.experimental.pallas import tpu as pltpu

_LANE = 128


def _round_up(n, m):
    return ((n + m - 1) // m) * m


def _num_tensorcores():
    """Best-effort detection of 2-TensorCore parts (v7x); falls back to 1."""
    try:
        kind = jax.devices()[0].device_kind.lower()
    except Exception:
        return 1
    return 2 if ("v7" in kind or "7x" in kind) else 1


def _pack_params(params, input_dim, hidden_dim, output_dim, w_dtype):
    """Pack PyTorch-layout weights/biases into two buffers.

    w_packed: (sum_i round8(out_i), K) with K = max(in_i); each layer's
              (out_i, in_i) weight occupies rows [off_i, off_i+out_i),
              columns [0, in_i), zero elsewhere.
    b_packed: (sum_i round8(out_i), 1) column vector with the same row offsets.
    """
    ins = (input_dim, hidden_dim, hidden_dim, hidden_dim)
    outs = (hidden_dim, hidden_dim, hidden_dim, output_dim)
    k = max(ins)
    offs, total = [], 0
    for o in outs:
        offs.append(total)
        total += _round_up(o, 8)            # keep sub-slices sublane-aligned
    w_packed = jnp.zeros((total, k), jnp.float32)
    b_packed = jnp.zeros((total, 1), jnp.float32)
    for i in range(4):
        w = jnp.asarray(params[f"w{i + 1}"], jnp.float32)            # (out, in)
        b = jnp.asarray(params[f"b{i + 1}"], jnp.float32).reshape(-1, 1)
        w_packed = w_packed.at[offs[i]:offs[i] + outs[i], :ins[i]].set(w)
        b_packed = b_packed.at[offs[i]:offs[i] + outs[i], :].set(b)
    meta = tuple((offs[i], outs[i], ins[i]) for i in range(4))
    return w_packed.astype(w_dtype), b_packed, meta


def _mlp_kernel(scale_shift_ref,   # SMEM (2,): [action_scale, action_shift]
                x_ref,             # VMEM (input_dim, batch_tile), batch on lanes
                w_ref,             # VMEM packed weights (rows, K), resident
                b_ref,             # VMEM packed biases  (rows, 1), resident
                o_ref,             # VMEM (output_dim, batch_tile)
                *, layer_meta):
    h = x_ref[...].astype(jnp.float32)                       # (in, btile)
    n_layers = len(layer_meta)
    for li, (off, out_i, in_i) in enumerate(layer_meta):
        w = w_ref[pl.ds(off, out_i), pl.ds(0, in_i)]          # (out_i, in_i)
        b = b_ref[pl.ds(off, out_i), :]                       # (out_i, 1) f32
        # h_out = W_pt @ h_in + b ; f32 accumulation on the MXU.
        h = jnp.dot(w, h.astype(w.dtype),
                    preferred_element_type=jnp.float32) + b
        if li + 1 < n_layers:
            h = jnp.maximum(h, 0.0)                           # hidden: ReLU
        else:
            h = jnp.tanh(h)                                   # output: Tanh
    scale = scale_shift_ref[0]
    shift = scale_shift_ref[1]
    o_ref[...] = (h * scale + shift).astype(o_ref.dtype)      # lane-dense store


def inverse_dynamic_forward(x, params, *, action_shift=0.0, action_scale=1.0,
                            max_batch_tile=2048, use_bf16_matmul=False,
                            num_cores=None):
    """InverseDynamicModule forward pass as a single Pallas TPU kernel.

    x:      [B, input_dim] float32
    params: dict with PyTorch-layout weights w1..w4 of shape
            (out_features, in_features) and biases b1..b4 of shape (out_features,).
    Note: use_bf16_matmul pre-casts the packed weights once in the wrapper
    (biases/activations stay f32-accumulated); it will not meet 1e-5 tolerance.
    """
    B, input_dim = x.shape
    hidden_dim = params["w1"].shape[0]
    output_dim = params["w4"].shape[0]

    w_dtype = jnp.bfloat16 if use_bf16_matmul else jnp.float32
    w_packed, b_packed, layer_meta = _pack_params(
        params, input_dim, hidden_dim, output_dim, w_dtype)

    # Runtime scalars live in SMEM -> changing them never triggers a recompile.
    scale_shift = jnp.asarray([action_scale, action_shift], dtype=jnp.float32)

    # ---- batch tiling: batch on lanes, always padded to a multiple of 128 ----
    if num_cores is None:
        num_cores = _num_tensorcores()
    b_pad = max(_LANE, _round_up(B, _LANE))
    if b_pad <= max_batch_tile:
        batch_tile = b_pad                       # whole batch in one tile
    else:
        batch_tile = _round_up(max_batch_tile, _LANE)
        b_pad = _round_up(b_pad, batch_tile)
    # v7x (2 TCs): keep >= num_cores "parallel" grid steps when possible.
    if num_cores > 1 and (b_pad // batch_tile) < num_cores and batch_tile > _LANE:
        batch_tile = _round_up(pl.cdiv(b_pad, num_cores), _LANE)
        b_pad = _round_up(b_pad, batch_tile)
    grid = (b_pad // batch_tile,)

    # Present x transposed: (input_dim, b_pad). (Upstream producers that can
    # emit x already transposed/bf16 skip this XLA-side layout plumbing.)
    x_t = jnp.pad(x.astype(jnp.float32), ((0, b_pad - B), (0, 0))).T

    kernel = functools.partial(_mlp_kernel, layer_meta=layer_meta)

    out_t = pl.pallas_call(
        kernel,
        out_shape=jax.ShapeDtypeStruct((output_dim, b_pad), jnp.float32),
        grid_spec=pltpu.PrefetchScalarGridSpec(
            num_scalar_prefetch=0,
            grid=grid,
            in_specs=[
                pl.BlockSpec(memory_space=pltpu.MemorySpace.SMEM),          # scale/shift
                pl.BlockSpec((input_dim, batch_tile), lambda i: (0, i)),    # x^T tile
                pl.BlockSpec(w_packed.shape, lambda i: (0, 0)),             # packed W (resident)
                pl.BlockSpec(b_packed.shape, lambda i: (0, 0)),             # packed b (resident)
            ],
            out_specs=pl.BlockSpec((output_dim, batch_tile), lambda i: (0, i)),
        ),
        compiler_params=pltpu.CompilerParams(
            dimension_semantics=("parallel",)),
    )(scale_shift, x_t, w_packed, b_packed)

    # Drop lane padding, return (B, output_dim) like the PyTorch module.
    return out_t[:, :B].T


def init_params(key, input_dim, hidden_dim, output_dim):
    """nn.Linear-style init (uniform +/- 1/sqrt(fan_in)); weights kept in native
    PyTorch (out_features, in_features) layout, biases (out_features,)."""
    dims = [(input_dim, hidden_dim),
            (hidden_dim, hidden_dim),
            (hidden_dim, hidden_dim),
            (hidden_dim, output_dim)]
    params = {}
    for idx, (fan_in, fan_out) in enumerate(dims, start=1):
        key, kw, kb = jax.random.split(key, 3)
        bound = 1.0 / (fan_in ** 0.5)
        params[f"w{idx}"] = jax.random.uniform(
            kw, (fan_out, fan_in), jnp.float32, -bound, bound)
        params[f"b{idx}"] = jax.random.uniform(
            kb, (fan_out,), jnp.float32, -bound, bound)
    return params


def reference_forward(x, params, action_shift, action_scale):
    h = jax.nn.relu(x @ params["w1"].T + params["b1"])
    h = jax.nn.relu(h @ params["w2"].T + params["b2"])
    h = jax.nn.relu(h @ params["w3"].T + params["b3"])
    y = jnp.tanh(h @ params["w4"].T + params["b4"])
    return y * action_scale + action_shift


if __name__ == "__main__":
    # Small shapes consistent with the module: batch=16, obs-pair input 32,
    # hidden 32, action output 8.
    B, input_dim, hidden_dim, output_dim = 16, 32, 32, 8
    action_shift, action_scale = 0.5, 2.0

    key = jax.random.PRNGKey(0)
    key, kx = jax.random.split(key)
    x = jax.random.normal(kx, (B, input_dim), jnp.float32)
    params = init_params(key, input_dim, hidden_dim, output_dim)

    out = inverse_dynamic_forward(
        x, params, action_shift=action_shift, action_scale=action_scale)
    out = jax.block_until_ready(out)

    ref = reference_forward(x, params, action_shift, action_scale)
    assert out.shape == (B, output_dim)
    assert jnp.allclose(out, ref, atol=1e-5, rtol=1e-5), "mismatch vs reference"

    print("KERNEL_OK")
</pallas_src>

<mosaic_0001>
module attributes {stable_mosaic.version = 11 : i64} {
  func.func @_mlp_kernel(%arg0: i32, %arg1: memref<2xf32, #tpu.memory_space<smem>>, %arg2: memref<32x128xf32, #tpu.memory_space<vmem>>, %arg3: memref<104x32xf32, #tpu.memory_space<vmem>>, %arg4: memref<104x1xf32, #tpu.memory_space<vmem>>, %arg5: memref<8x128xf32, #tpu.memory_space<vmem>>) attributes {dimension_semantics = [#tpu.dimension_semantics<parallel>], iteration_bounds = array<i64: 1>, scalar_prefetch = 0 : i64, scratch_operands = 0 : i64, tpu.core_type = #tpu.core_type<tc>, window_params = [{transform_indices = @transform_0, window_bounds = array<i64: 2>}, {transform_indices = @transform_1, window_bounds = array<i64: 32, 128>}, {pipeline_mode = #tpu.pipeline_mode<synchronous>, transform_indices = @transform_2, window_bounds = array<i64: 104, 32>}, {pipeline_mode = #tpu.pipeline_mode<synchronous>, transform_indices = @transform_3, window_bounds = array<i64: 104, 1>}, {transform_indices = @transform_4, window_bounds = array<i64: 8, 128>}]} {
    %c0 = arith.constant 0 : index
    %c0_0 = arith.constant 0 : index
    %0 = vector.load %arg2[%c0, %c0_0] : memref<32x128xf32, #tpu.memory_space<vmem>>, vector<32x128xf32>
    %c0_1 = arith.constant 0 : index
    %c0_2 = arith.constant 0 : index
    %1 = vector.load %arg3[%c0_1, %c0_2] : memref<104x32xf32, #tpu.memory_space<vmem>>, vector<32x32xf32>
    %c0_3 = arith.constant 0 : index
    %c0_4 = arith.constant 0 : index
    %2 = vector.load %arg4[%c0_3, %c0_4] : memref<104x1xf32, #tpu.memory_space<vmem>>, vector<32x1xf32>
    %cst = arith.constant dense<0.000000e+00> : vector<32x128xf32>
    %3 = tpu.matmul %1, %0, %cst {dimension_numbers = #tpu.dot_dimension_numbers<[1], [0], [0], [1], [0, 0, 1, 1], [], []>} : vector<32x32xf32>, vector<32x128xf32>, vector<32x128xf32> -> vector<32x128xf32>
    %4 = vector.broadcast %2 : vector<32x1xf32> to vector<32x128xf32>
    %5 = arith.addf %3, %4 : vector<32x128xf32>
    %cst_5 = arith.constant 0.000000e+00 : f32
    %6 = vector.broadcast %cst_5 : f32 to vector<32x128xf32>
    %7 = arith.maximumf %5, %6 : vector<32x128xf32>
    %c32 = arith.constant 32 : index
    %c0_6 = arith.constant 0 : index
    %8 = vector.load %arg3[%c32, %c0_6] : memref<104x32xf32, #tpu.memory_space<vmem>>, vector<32x32xf32>
    %c32_7 = arith.constant 32 : index
    %c0_8 = arith.constant 0 : index
    %9 = vector.load %arg4[%c32_7, %c0_8] : memref<104x1xf32, #tpu.memory_space<vmem>>, vector<32x1xf32>
    %cst_9 = arith.constant dense<0.000000e+00> : vector<32x128xf32>
    %10 = tpu.matmul %8, %7, %cst_9 {dimension_numbers = #tpu.dot_dimension_numbers<[1], [0], [0], [1], [0, 0, 1, 1], [], []>} : vector<32x32xf32>, vector<32x128xf32>, vector<32x128xf32> -> vector<32x128xf32>
    %11 = vector.broadcast %9 : vector<32x1xf32> to vector<32x128xf32>
    %12 = arith.addf %10, %11 : vector<32x128xf32>
    %cst_10 = arith.constant 0.000000e+00 : f32
    %13 = vector.broadcast %cst_10 : f32 to vector<32x128xf32>
    %14 = arith.maximumf %12, %13 : vector<32x128xf32>
    %c64 = arith.constant 64 : index
    %c0_11 = arith.constant 0 : index
    %15 = vector.load %arg3[%c64, %c0_11] : memref<104x32xf32, #tpu.memory_space<vmem>>, vector<32x32xf32>
    %c64_12 = arith.constant 64 : index
    %c0_13 = arith.constant 0 : index
    %16 = vector.load %arg4[%c64_12, %c0_13] : memref<104x1xf32, #tpu.memory_space<vmem>>, vector<32x1xf32>
    %cst_14 = arith.constant dense<0.000000e+00> : vector<32x128xf32>
    %17 = tpu.matmul %15, %14, %cst_14 {dimension_numbers = #tpu.dot_dimension_numbers<[1], [0], [0], [1], [0, 0, 1, 1], [], []>} : vector<32x32xf32>, vector<32x128xf32>, vector<32x128xf32> -> vector<32x128xf32>
    %18 = vector.broadcast %16 : vector<32x1xf32> to vector<32x128xf32>
    %19 = arith.addf %17, %18 : vector<32x128xf32>
    %cst_15 = arith.constant 0.000000e+00 : f32
    %20 = vector.broadcast %cst_15 : f32 to vector<32x128xf32>
    %21 = arith.maximumf %19, %20 : vector<32x128xf32>
    %c96 = arith.constant 96 : index
    %c0_16 = arith.constant 0 : index
    %22 = vector.load %arg3[%c96, %c0_16] : memref<104x32xf32, #tpu.memory_space<vmem>>, vector<8x32xf32>
    %c96_17 = arith.constant 96 : index
    %c0_18 = arith.constant 0 : index
    %23 = vector.load %arg4[%c96_17, %c0_18] : memref<104x1xf32, #tpu.memory_space<vmem>>, vector<8x1xf32>
    %cst_19 = arith.constant dense<0.000000e+00> : vector<8x128xf32>
    %24 = tpu.matmul %22, %21, %cst_19 {dimension_numbers = #tpu.dot_dimension_numbers<[1], [0], [0], [1], [0, 0, 1, 1], [], []>} : vector<8x32xf32>, vector<32x128xf32>, vector<8x128xf32> -> vector<8x128xf32>
    %25 = vector.broadcast %23 : vector<8x1xf32> to vector<8x128xf32>
    %26 = arith.addf %24, %25 : vector<8x128xf32>
    %27 = math.tanh %26 : vector<8x128xf32>
    %c0_20 = arith.constant 0 : index
    %28 = memref.load %arg1[%c0_20] : memref<2xf32, #tpu.memory_space<smem>>
    %c1 = arith.constant 1 : index
    %29 = memref.load %arg1[%c1] : memref<2xf32, #tpu.memory_space<smem>>
    %30 = vector.broadcast %28 : f32 to vector<8x128xf32>
    %31 = arith.mulf %27, %30 : vector<8x128xf32>
    %32 = vector.broadcast %29 : f32 to vector<8x128xf32>
    %33 = arith.addf %31, %32 : vector<8x128xf32>
    %c0_21 = arith.constant 0 : index
    %c0_22 = arith.constant 0 : index
    %34 = vector.load %arg5[%c0_21, %c0_22] : memref<8x128xf32, #tpu.memory_space<vmem>>, vector<8x128xf32>
    tpu.vector_store %arg5[%c0_21, %c0_22], %33 {strides = array<i32>} : memref<8x128xf32, #tpu.memory_space<vmem>>, vector<8x128xf32>,
    return
  }
  func.func @transform_0(%arg0: i32) -> i32 {
    %c0_i32 = arith.constant 0 : i32
    %c0_i32_0 = arith.constant 0 : i32
    return %c0_i32 : i32
  }
  func.func @transform_1(%arg0: i32) -> (i32, i32) {
    %c0_i32 = arith.constant 0 : i32
    %c0_i32_0 = arith.constant 0 : i32
    return %c0_i32, %arg0 : i32, i32
  }
  func.func @transform_2(%arg0: i32) -> (i32, i32) {
    %c0_i32 = arith.constant 0 : i32
    %c0_i32_0 = arith.constant 0 : i32
    %c0_i32_1 = arith.constant 0 : i32
    return %c0_i32, %c0_i32_0 : i32, i32
  }
  func.func @transform_3(%arg0: i32) -> (i32, i32) {
    %c0_i32 = arith.constant 0 : i32
    %c0_i32_0 = arith.constant 0 : i32
    %c0_i32_1 = arith.constant 0 : i32
    return %c0_i32, %c0_i32_0 : i32, i32
  }
  func.func @transform_4(%arg0: i32) -> (i32, i32) {
    %c0_i32 = arith.constant 0 : i32
    %c0_i32_0 = arith.constant 0 : i32
    return %c0_i32, %arg0 : i32, i32
  }
}

</mosaic_0001>

<bundles_post_ra>
// kernel: tpu_custom_call.1
= control target key start
LH: loop header
LB: loop body
LE: loop exit
PB: predicated region body
PF: predicated region fallthrough
CT: control target
= control target key end

     0   :  { %9 = vsyncpa [#allocation4], 0  ;;  %s806_s0 = inlined_call_operand.vmem [shape: f32[2], index: 0, kind: input, shape index: {}]   ;;  %s807_s1 = inlined_call_operand.vmem [shape: f32[32,128], index: 1, kind: input, shape index: {}]   ;;  %s808_s2 = inlined_call_operand.vmem [shape: f32[104,32], index: 2, kind: input, shape index: {}]   ;;  %s809_s3 = inlined_call_operand.vmem [shape: f32[104,1], index: 3, kind: input, shape index: {}]   ;;  %s810_s4 = inlined_call_operand.hbm [shape: f32[8,128], index: 4, kind: output, shape index: {}]  }
   0x1   :  { %10 = vsyncpa [#allocation3], 0  ;;  %s17_s17 = sshll.u32 %s806_s0, 4  ;;  %s18_s17 = int_to_ptr.vmem [resolvable:$true] %s17_s17 }
   0x2   :  { %s631_s18 = scalar_lea.vmem %s18_s17, 16  ;;  %p636_p1 = scmp.lt.s32.totalorder %s18_s17, %s18_s17 }
   0x3   :  { %p632_p0 = scmp.ne.s32.totalorder %s18_s17, %s631_s18  ;;  %p637_p2 = scmp.lt.s32.totalorder %s631_s18, %s631_s18 }
   0x5   :  { %p638_p3 = por %p637_p2, %p636_p1 }
   0x7   :  { %p639_p4 = pnand %p638_p3, %p632_p0 }
   0x9   :  { %642 = shalt.err (!%p639_p4)
}
   0xa   :  { %s667_s19 = smov [#allocation2]  }
   0xb   :  { %20 = dma.vmem_to_smem %s18_s17, 16, %s667_s19, [#allocation4]  }
   0xc   :  { %663 = dma.done.wait [#allocation4], 16  }
   0xd   :  { %664 = vsyncadd [#allocation4], 4294967280 }
   0xe   :  { %30 = sfence }
   0xf   :  { %v34_v0 = vld [vmem:[%s807_s1 + $0x18] sm:$0xff]  ;;  %v33_v1 = vld [vmem:[%s807_s1 + $0x10] sm:$0xff]  ;;  %vm63_vm0 = vcmask 261120   ;;  %v35_v2 = vld [vmem:[%s808_s2] sm:$0xff]  ;;  %v668_v3 = vmov 0   ;;  %v669_v62 = vmov 0.0  }
  0x10   :  { %569 = vmatprep.subr.mxu0 %v34_v0  ;;  %627 = vset.pattern.permute.xlu0 %v668_v3  ;;  %v32_v4 = vld [vmem:[%s807_s1 + $0x8] sm:$0xff]  ;;  %v42_v5 = vld [vmem:[%s809_s3 + $0x18] sm:$0xff]  ;;  %v31_v7 = vld [vmem:[%s807_s1] sm:$0xff]  ;;  %vm670_vm1 = vmmov 0   ;;  %s504_s23 = sld [smem:[#allocation2]]  ;;  %s671_s24 = smov [#allocation5]  }
  0x11   :  { %570 = vmatpush3.msra.mxu0 %v34_v0  ;;  %577 = vmatprep.mubr.msk.f32.mxu0 %vm63_vm0, %v35_v2  ;;  %v40_v6 = vld [vmem:[%s809_s3 + $0x8] sm:$0xff]  ;;  %v41_v8 = vld [vmem:[%s809_s3 + $0x10] sm:$0xff]  ;;  %v39_v10 = vld [vmem:[%s809_s3] sm:$0xff]  ;;  %s539_s0 = sld [smem:[#allocation2 + $0x1]]  ;;  %s517_s25 = sshll.u32 %s671_s24, 4  ;;  %s518_s25 = int_to_ptr.vmem [resolvable:$true] %s517_s25 }
  0x12   :  { %571 = vmatprep.subr.mxu0 %v33_v1  ;;  %60 = vperm.xlu0 %627, %v42_v5   ;;  %v36_v9 = vld [vmem:[%s808_s2 + $0x8] sm:$0xff]  ;;  %v37_v11 = vld [vmem:[%s808_s2 + $0x10] sm:$0xff]  ;;  %v172_v12 = vld [vmem:[%s809_s3 + $0x38] sm:$0xff]  ;;  %p648_p6 = scmp.lt.s32.totalorder %s518_s25, %s518_s25 }
  0x13   :  { %572 = vmatpush3.msra.mxu0 %v33_v1  ;;  %628 = vset.pattern.permute.xlu1 %v668_v3  ;;  %v38_v13 = vld [vmem:[%s808_s2 + $0x18] sm:$0xff]  ;;  %v171_v14 = vld [vmem:[%s809_s3 + $0x30] sm:$0xff]  ;;  %v170_v15 = vld [vmem:[%s809_s3 + $0x28] sm:$0xff] }
  0x14   :  { %573 = vmatprep.subr.mxu0 %v32_v4  ;;  %50 = vperm.xlu1 %628, %v40_v6   ;;  %v169_v16 = vld [vmem:[%s809_s3 + $0x20] sm:$0xff]  ;;  %v301_v17 = vld [vmem:[%s809_s3 + $0x58] sm:$0xff]  ;;  %v300_v18 = vld [vmem:[%s809_s3 + $0x50] sm:$0xff] }
  0x15   :  { %574 = vmatpush3.msra.mxu0 %v32_v4  ;;  %v299_v19 = vld [vmem:[%s809_s3 + $0x48] sm:$0xff]  ;;  %v298_v20 = vld [vmem:[%s809_s3 + $0x40] sm:$0xff]  ;;  %v167_v40 = vld [vmem:[%s808_s2 + $0x30] sm:$0xff] }
  0x16   :  { %575 = vmatprep.subr.mxu0 %v31_v7  ;;  %55 = vperm.xlu0 %627, %v41_v8   ;;  %v424_v21 = vld [vmem:[%s809_s3 + $0x60] sm:$0xff]  ;;  %v166_v39 = vld [vmem:[%s808_s2 + $0x28] sm:$0xff]  ;;  %v168_v41 = vld [vmem:[%s808_s2 + $0x38] sm:$0xff] }
  0x17   :  { %576 = vmatpush3.msra.mxu0 %v31_v7  ;;  %v165_v22 = vld [vmem:[%s808_s2 + $0x20] sm:$0xff]  ;;  %v295_v59 = vld [vmem:[%s808_s2 + $0x48] sm:$0xff]  ;;  %v296_v60 = vld [vmem:[%s808_s2 + $0x50] sm:$0xff] }
  0x18   :  { %578 = vmatmul.mubr.msk.f32.vlgmr.msra.gmra.mxu0 %vm63_vm0, %v36_v9  ;;  %45 = vperm.xlu1 %628, %v39_v10   ;;  %v294_v42 = vld [vmem:[%s808_s2 + $0x40] sm:$0xff]  ;;  %v297_v61 = vld [vmem:[%s808_s2 + $0x58] sm:$0xff] }
  0x19   :  { %580 = vmatprep.mubr.msk.f32.mxu0 %vm63_vm0, %v37_v11  ;;  %591 = vmatprep.mubr.msk.f32.mxu1 %vm63_vm0, %v165_v22  ;;  %v508_v22 = vstv %s539_s0 }
  0x1a   :  { %190 = vperm.xlu0 %627, %v172_v12  }
  0x1c   :  { %581 = vmatmul.mubr.msk.f32.gmra.mxu0 %vm63_vm0, %v38_v13  ;;  %185 = vperm.xlu1 %628, %v171_v14  }
  0x1d   :  { %605 = vmatprep.mubr.msk.f32.mxu0 %vm63_vm0, %v294_v42 }
  0x1e   :  { %180 = vperm.xlu0 %627, %v170_v15   ;;  %v423_v15 = vld [vmem:[%s808_s2 + $0x60] sm:$0xff]  ;;  %s643_s2 = scalar_lea.vmem %s518_s25, 128 }
  0x1f   :  { %p644_p5 = scmp.ne.s32.totalorder %s518_s25, %s643_s2  ;;  %p649_p7 = scmp.lt.s32.totalorder %s643_s2, %s643_s2 }
  0x20   :  { %175 = vperm.xlu1 %628, %v169_v16  }
  0x21   :  { %p650_p8 = por %p649_p7, %p648_p6 }
  0x22   :  { %319 = vperm.xlu0 %627, %v301_v17  }
  0x23   :  { %p651_p9 = pnand %p650_p8, %p644_p5 }
  0x24   :  { %314 = vperm.xlu1 %628, %v300_v18  }
  0x26   :  { %309 = vperm.xlu0 %627, %v299_v19  }
  0x28   :  { %304 = vperm.xlu1 %628, %v298_v20   ;;  %v506_v20 = vstv %s504_s23 }
  0x2a   :  { %427 = vperm.xlu0 %627, %v424_v21  }
  0x8d   :  { %v61_v23 = vpop.permute.xlu0 %60 }
  0x8f   :  { %v51_v25 = vpop.permute.xlu1 %50 }
  0x91   :  { %v56_v29 = vpop.permute.xlu0 %55 }
  0x93   :  { %v46_v34 = vpop.permute.xlu1 %45 }
  0x95   :  { %v191_v43 = vpop.permute.xlu0 %190 }
  0x97   :  { %v186_v45 = vpop.permute.xlu1 %185 }
  0x99   :  { %v181_v49 = vpop.permute.xlu0 %180 }
  0x9b   :  { %v176_v54 = vpop.permute.xlu1 %175 }
  0x9d   :  { %v320_v63 = vpop.permute.xlu0 %319 }
  0x9f   :  { %v315_v1 = vpop.permute.xlu1 %314 }
  0xa1   :  { %v310_v5 = vpop.permute.xlu0 %309 }
  0xa3   :  { %v305_v10 = vpop.permute.xlu1 %304 }
  0xa5   :  { %v428_v16 = vpop.permute.xlu0 %427 }
  0xd8   :  { %v579_v24 = vpop.f32.mrf.mxu0 }
  0xd9   :  { %v148_v31 = vadd.f32 %v579_v24, %v51_v25 }
  0xda   :  { %v142_v26 = vpop.f32.mrf.mxu0 }
  0xdb   :  { %v143_v35 = vadd.f32 %v142_v26, %v46_v34  ;;  %v162_v37 = vmax.f32 %v148_v31, 0.0 }
  0xdc   :  { %v582_v27 = vpop.f32.mrf.mxu0 }
  0xdd   :  { %v158_v28 = vadd.f32 %v582_v27, %v61_v23  ;;  %v161_v38 = vmax.f32 %v143_v35, 0.0 }
  0xde   :  { %v152_v30 = vpop.f32.mrf.mxu0 }
  0xdf   :  { %v164_v32 = vmax.f32 %v158_v28, 0.0  ;;  %v153_v33 = vadd.f32 %v152_v30, %v56_v29 }
  0xe1   :  { %v163_v36 = vmax.f32 %v153_v33, 0.0  ;;  %583 = vmatprep.subr.mxu1 %v164_v32 }
  0xe2   :  { %584 = vmatpush3.msra.mxu1 %v164_v32 }
  0xe3   :  { %585 = vmatprep.subr.mxu1 %v163_v36 }
  0xe4   :  { %586 = vmatpush3.msra.mxu1 %v163_v36 }
  0xe5   :  { %587 = vmatprep.subr.mxu1 %v162_v37 }
  0xe6   :  { %588 = vmatpush3.msra.mxu1 %v162_v37 }
  0xe7   :  { %589 = vmatprep.subr.mxu1 %v161_v38 }
  0xe8   :  { %590 = vmatpush3.msra.mxu1 %v161_v38 }
  0xe9   :  { %592 = vmatmul.mubr.msk.f32.vlgmr.msra.gmra.mxu1 %vm63_vm0, %v166_v39  ;;  %611 = vmatprep.subr.mxu1 %v669_v62 }
  0xea   :  { %594 = vmatprep.mubr.msk.f32.mxu1 %vm63_vm0, %v167_v40 }
  0xed   :  { %595 = vmatmul.mubr.msk.f32.gmra.mxu1 %vm63_vm0, %v168_v41 }
  0xee   :  { %619 = vmatprep.mubr.msk.f32.mxu1 %vm670_vm1, %v669_v62 }
 0x1a9   :  { %v593_v44 = vpop.f32.mrf.mxu1 }
 0x1aa   :  { %v277_v51 = vadd.f32 %v593_v44, %v181_v49 }
 0x1ab   :  { %v271_v46 = vpop.f32.mrf.mxu1 }
 0x1ac   :  { %v272_v55 = vadd.f32 %v271_v46, %v176_v54  ;;  %v291_v57 = vmax.f32 %v277_v51, 0.0 }
 0x1ad   :  { %v596_v47 = vpop.f32.mrf.mxu1 }
 0x1ae   :  { %v287_v48 = vadd.f32 %v596_v47, %v191_v43  ;;  %v290_v58 = vmax.f32 %v272_v55, 0.0 }
 0x1af   :  { %v281_v50 = vpop.f32.mrf.mxu1 }
 0x1b0   :  { %v293_v52 = vmax.f32 %v287_v48, 0.0  ;;  %v282_v53 = vadd.f32 %v281_v50, %v186_v45 }
 0x1b2   :  { %v292_v56 = vmax.f32 %v282_v53, 0.0  ;;  %597 = vmatprep.subr.mxu0 %v293_v52 }
 0x1b3   :  { %598 = vmatpush3.msra.mxu0 %v293_v52 }
 0x1b4   :  { %599 = vmatprep.subr.mxu0 %v292_v56 }
 0x1b5   :  { %600 = vmatpush3.msra.mxu0 %v292_v56 }
 0x1b6   :  { %601 = vmatprep.subr.mxu0 %v291_v57 }
 0x1b7   :  { %602 = vmatpush3.msra.mxu0 %v291_v57 }
 0x1b8   :  { %603 = vmatprep.subr.mxu0 %v290_v58 }
 0x1b9   :  { %604 = vmatpush3.msra.mxu0 %v290_v58 }
 0x1ba   :  { %606 = vmatmul.mubr.msk.f32.vlgmr.msra.gmra.mxu0 %vm63_vm0, %v295_v59 }
 0x1bb   :  { %608 = vmatprep.mubr.msk.f32.mxu0 %vm63_vm0, %v296_v60 }
 0x1be   :  { %609 = vmatmul.mubr.msk.f32.gmra.mxu0 %vm63_vm0, %v297_v61 }
 0x27a   :  { %v607_v0 = vpop.f32.mrf.mxu0 }
 0x27b   :  { %v406_v7 = vadd.f32 %v607_v0, %v310_v5 }
 0x27c   :  { %v400_v2 = vpop.f32.mrf.mxu0 }
 0x27d   :  { %v401_v11 = vadd.f32 %v400_v2, %v305_v10  ;;  %v420_v13 = vmax.f32 %v406_v7, 0.0 }
 0x27e   :  { %v610_v3 = vpop.f32.mrf.mxu0 }
 0x27f   :  { %v416_v4 = vadd.f32 %v610_v3, %v320_v63  ;;  %v419_v14 = vmax.f32 %v401_v11, 0.0 }
 0x280   :  { %v410_v6 = vpop.f32.mrf.mxu0 }
 0x281   :  { %v422_v8 = vmax.f32 %v416_v4, 0.0  ;;  %v411_v9 = vadd.f32 %v410_v6, %v315_v1 }
 0x283   :  { %v421_v12 = vmax.f32 %v411_v9, 0.0  ;;  %612 = vmatpush3.msra.mxu1 %v422_v8 }
 0x284   :  { %613 = vmatprep.subr.mxu1 %v669_v62 }
 0x285   :  { %614 = vmatpush3.msra.mxu1 %v421_v12 }
 0x286   :  { %615 = vmatprep.subr.mxu1 %v669_v62 }
 0x287   :  { %616 = vmatpush3.msra.mxu1 %v420_v13 }
 0x288   :  { %617 = vmatprep.subr.mxu1 %v669_v62 }
 0x289   :  { %618 = vmatpush3.msra.mxu1 %v419_v14 }
 0x28a   :  { %620 = vmatmul.mubr.msk.f32.vlgmr.msra.gmra.mxu1 %vm63_vm0, %v423_v15 }
 0x34a   :  { %v499_v17 = vpop.f32.mrf.mxu1 }
 0x34b   :  { %v500_v18 = vadd.f32 %v499_v17, %v428_v16 }
 0x34c   :  { %v621_v19 = vpop.f32.mrf.mxu1 }
 0x34d   :  { %629 = vtanh.f32 %v500_v18 }
 0x35a   :  { %v630_v21 = vpop.eup %629 }
 0x35b   :  { %v507_v23 = vmul.f32 %v630_v21, %v506_v20 }
 0x35d   :  { %v509_v24 = vadd.f32 %v508_v22, %v507_v23 }
 0x35f   :  { %510 = vst [vmem:[#allocation5] sm:$0xff] %v509_v24 }
 0x360   :  { %654 = shalt.err (!%p651_p9)
}
 0x361   :  { %520 = dma.vmem_to_hbm [thread:$0]  %s518_s25, 128, %s810_s4, [#allocation3]  }
 0x362   :  { %665 = dma.done.wait [#allocation3], 128  }
 0x363   :  { %666 = vsyncadd [#allocation3], 4294967168 }
 0x364   :  { %524 = vsyncpa [#allocation3], 1 }
 0x365   :  { %525 = vsyncpa [#allocation4], 1 }

</bundles_post_ra>
